<compile_context>
chip_gen: v6e
topology: v6e:2x2x1
jax: 0.10.0
libtpu: 0.0.40
codegen_flags: <defaults>
</compile_context>

<pallas_src>
import functools

import numpy as np
import jax
import jax.numpy as jnp
from jax.experimental import pallas as pl
from jax.experimental.pallas import tpu as pltpu


# ----------------------------- Pallas kernels -----------------------------

def _down_conv_relu_kernel(t_ref, w_ref, o_ref):
    # t_ref: (1, 9*Cin, Ho*Wo)  strided im2col taps for one image
    # w_ref: (Cout, 9*Cin)
    # o_ref: (1, Cout, Ho*Wo)   lane-dense output
    acc = jnp.dot(w_ref[...], t_ref[0], preferred_element_type=jnp.float32)
    o_ref[0] = jnp.maximum(acc, 0.0).astype(o_ref.dtype)   # conv (no bias) + ReLU


def _gru_kernel(xp_ref, dp_ref, *refs, cx, W, HW, has_prev):
    # xp_ref: (1, Cx, L)   flat x with (W+1) zeros padded front/back, L = HW + 2W + 2
    # dp_ref: (1, 1, L)    flat d, same padding
    # prev_ref (optional): (1, Cout, HW)
    # wgx_ref: (Cout, 9*Cx)  gate conv weights, x channels, tap-major rows
    # wgd_ref: (Cout, 9)     gate conv weights, depth channel
    # wdh_ref/bdh_ref: (Cout, 1)  1x1 d_conv_hidden
    # wh_ref : (Cout, 9*Cx)  conv_hidden weights
    # bg_ref/bh_ref: (Cout, 1)
    # o_ref  : (1, Cout, HW)
    if has_prev:
        (prev_ref, wgx_ref, wgd_ref, bg_ref, wdh_ref, bdh_ref,
         wh_ref, bh_ref, o_ref) = refs
    else:
        (wgx_ref, wgd_ref, bg_ref, wdh_ref, bdh_ref,
         wh_ref, bh_ref, o_ref) = refs
        prev_ref = None

    cout = o_ref.shape[1]
    P = W + 1

    x_pad = xp_ref[0]                       # (Cx, L), compute dtype
    d_pad = dp_ref[0]                       # (1, L)
    d_f32 = d_pad.astype(jnp.float32)

    # Depth-gated hidden input, computed ONCE on the padded-flat layout.
    # x_pad == 0 on the pad region, so m_pad == 0 there as well.
    # Requires Cx == Cout (asserted in the wrapper; true for FuseGRUBlock).
    sig = jax.nn.sigmoid(d_f32 * wdh_ref[...] + bdh_ref[...])     # (Cout, L)
    m_pad = (x_pad.astype(jnp.float32) * sig).astype(x_pad.dtype)  # (Cx, L)

    # Column masks for the horizontal taps (vertical out-of-range reads land in
    # the zero padding automatically).
    col = jax.lax.broadcasted_iota(jnp.int32, (1, HW), 1) % W
    left_ok = col >= 1          # valid positions for a dx = -1 tap
    right_ok = col <= W - 2     # valid positions for a dx = +1 tap

    wgd = wgd_ref[...]          # (Cout, 9), f32
    gate = jnp.zeros((cout, HW), jnp.float32)
    x_taps = []
    m_taps = []
    t = 0
    for dy in (-1, 0, 1):
        for dx in (-1, 0, 1):
            s = P + dy * W + dx
            xt = x_pad[:, s:s + HW]
            mt = m_pad[:, s:s + HW]
            dt = d_f32[:, s:s + HW]
            if dx == -1:
                xt = jnp.where(left_ok, xt, 0)
                mt = jnp.where(left_ok, mt, 0)
                dt = jnp.where(left_ok, dt, 0)
            elif dx == 1:
                xt = jnp.where(right_ok, xt, 0)
                mt = jnp.where(right_ok, mt, 0)
                dt = jnp.where(right_ok, dt, 0)
            x_taps.append(xt)
            m_taps.append(mt)
            # single depth channel of the gate conv: broadcast FMA on the VPU
            gate = gate + wgd[:, t:t + 1] * dt
            t += 1

    x_im2col = jnp.concatenate(x_taps, axis=0)      # (9*Cx, HW)
    m_im2col = jnp.concatenate(m_taps, axis=0)      # (9*Cx, HW)

    # One big GEMM per path (K = 9*Cx), f32 accumulation on the MXU.
    gate = gate + jnp.dot(wgx_ref[...], x_im2col, preferred_element_type=jnp.float32)
    gate = jax.nn.sigmoid(gate + bg_ref[...])

    hid = jnp.dot(wh_ref[...], m_im2col, preferred_element_type=jnp.float32) + bh_ref[...]
    hid = jnp.where(hid >= 0.0, hid + 0.5, jax.nn.sigmoid(hid))   # g(x)

    if has_prev:
        prev = prev_ref[0]                          # (Cout, HW)
        out = prev + gate * (hid - prev)            # torch.lerp(prev_h, hidden, gate)
    else:
        out = hid * gate
    o_ref[0] = out.astype(o_ref.dtype)


# ----------------------------- JAX glue / wrappers -----------------------------

def _conv_w_to_gemm(w_hwio):
    # (3, 3, Cin, Cout) -> (Cout, 9*Cin); row index = t*Cin + cin with t = ky*3 + kx.
    kh, kw, cin, cout = w_hwio.shape
    return w_hwio.reshape(kh * kw, cin, cout).transpose(2, 0, 1).reshape(cout, kh * kw * cin)


def down_conv_relu(x, w_down, compute_dtype=jnp.float32):
    """3x3 conv, stride=2, padding=1, no bias, + ReLU.  x: (N, Cin, H, W) -> (N, Cout, Ho, Wo)."""
    n, cin, h, w = x.shape
    cout = w_down.shape[-1]
    ho = (h + 2 - 3) // 2 + 1
    wo = (w + 2 - 3) // 2 + 1
    xp = jnp.pad(x, ((0, 0), (0, 0), (1, 1), (1, 1)))
    taps = []
    for ky in range(3):
        for kx in range(3):
            taps.append(xp[:, :, ky:ky + 2 * ho:2, kx:kx + 2 * wo:2].reshape(n, cin, ho * wo))
    taps = jnp.stack(taps, axis=1).reshape(n, 9 * cin, ho * wo).astype(compute_dtype)
    wg = _conv_w_to_gemm(w_down).astype(compute_dtype)             # (Cout, 9*Cin)

    out = pl.pallas_call(
        _down_conv_relu_kernel,
        out_shape=jax.ShapeDtypeStruct((n, cout, ho * wo), jnp.float32),
        grid=(n,),
        in_specs=[
            pl.BlockSpec((1, 9 * cin, ho * wo), lambda i: (i, 0, 0)),
            pl.BlockSpec((cout, 9 * cin), lambda i: (0, 0)),
        ],
        out_specs=pl.BlockSpec((1, cout, ho * wo), lambda i: (i, 0, 0)),
        compiler_params=pltpu.CompilerParams(dimension_semantics=("parallel",)),
    )(taps, wg)
    return out.reshape(n, cout, ho, wo)


def fuse_conv_gru(x, d, h, params, compute_dtype=jnp.float32):
    """DepthConvGRU2d forward.  x: (N,Cx,H,W), d: (N,1,H,W), h: None or (N,Cout,H,W)."""
    n, cx, hh, ww = x.shape
    cout = params["w_hid"].shape[-1]
    assert cx == cout, "DepthConvGRU2d hidden path requires channels_x == channels_out"
    hw = hh * ww
    pad = ww + 1
    L = hw + 2 * pad   # flat length with (W+1) zeros front/back

    x_pf = jnp.pad(x.reshape(n, cx, hw), ((0, 0), (0, 0), (pad, pad))).astype(compute_dtype)
    d_pf = jnp.pad(d.reshape(n, 1, hw), ((0, 0), (0, 0), (pad, pad))).astype(compute_dtype)

    # Weight / bias repacking (tiny, done once per call in XLA).
    wgx = _conv_w_to_gemm(params["w_gate"][:, :, :cx, :]).astype(compute_dtype)  # (Cout, 9*Cx)
    wgd = params["w_gate"][:, :, cx, :].reshape(9, cout).T                        # (Cout, 9) f32
    wh = _conv_w_to_gemm(params["w_hid"]).astype(compute_dtype)                   # (Cout, 9*Cx)
    wdh = params["w_dh"].reshape(cout, 1)
    bg = params["b_gate"].reshape(cout, 1)
    bdh = params["b_dh"].reshape(cout, 1)
    bh = params["b_hid"].reshape(cout, 1)

    has_prev = h is not None
    kernel = functools.partial(_gru_kernel, cx=cx, W=ww, HW=hw, has_prev=has_prev)

    inputs = [x_pf, d_pf]
    in_specs = [
        pl.BlockSpec((1, cx, L), lambda i: (i, 0, 0)),
        pl.BlockSpec((1, 1, L), lambda i: (i, 0, 0)),
    ]
    if has_prev:
        inputs.append(h.reshape(n, cout, hw).astype(jnp.float32))
        in_specs.append(pl.BlockSpec((1, cout, hw), lambda i: (i, 0, 0)))
    inputs += [wgx, wgd, bg, wdh, bdh, wh, bh]
    in_specs += [
        pl.BlockSpec((cout, 9 * cx), lambda i: (0, 0)),
        pl.BlockSpec((cout, 9), lambda i: (0, 0)),
        pl.BlockSpec((cout, 1), lambda i: (0, 0)),
        pl.BlockSpec((cout, 1), lambda i: (0, 0)),
        pl.BlockSpec((cout, 1), lambda i: (0, 0)),
        pl.BlockSpec((cout, 9 * cx), lambda i: (0, 0)),
        pl.BlockSpec((cout, 1), lambda i: (0, 0)),
    ]

    out = pl.pallas_call(
        kernel,
        out_shape=jax.ShapeDtypeStruct((n, cout, hw), jnp.float32),
        grid=(n,),
        in_specs=in_specs,
        out_specs=pl.BlockSpec((1, cout, hw), lambda i: (i, 0, 0)),
        compiler_params=pltpu.CompilerParams(dimension_semantics=("parallel",)),
    )(*inputs)
    return out.reshape(n, cout, hh, ww)


def nearest_downsample_nchw(d, ho, wo):
    # F.interpolate(d, size=(ho, wo), mode='nearest'): src = floor(dst * in/out)
    n, c, h, w = d.shape
    ih = (jnp.arange(ho) * h) // ho
    iw = (jnp.arange(wo) * w) // wo
    return d[:, :, ih][:, :, :, iw]


def fuse_gru_block(x, d, h, params, stride, compute_dtype=jnp.float32):
    """FuseGRUBlock.forward(x, d, h) with NCHW tensors."""
    if stride == 2:
        x = down_conv_relu(x, params["w_down"], compute_dtype)
        d = nearest_downsample_nchw(d, x.shape[2], x.shape[3])
    return fuse_conv_gru(x, d, h, params, compute_dtype)


def init_params(key, in_ch, out_ch, stride):
    """Deterministic synthetic parameters matching the PyTorch module's shapes (HWIO)."""
    ks = jax.random.split(key, 7)
    s = 0.1
    p = {
        "w_gate": s * jax.random.normal(ks[0], (3, 3, out_ch + 1, out_ch), jnp.float32),
        "b_gate": s * jax.random.normal(ks[1], (out_ch,), jnp.float32),
        "w_dh":   s * jax.random.normal(ks[2], (1, 1, 1, out_ch), jnp.float32),
        "b_dh":   s * jax.random.normal(ks[3], (out_ch,), jnp.float32),
        "w_hid":  s * jax.random.normal(ks[4], (3, 3, out_ch, out_ch), jnp.float32),
        "b_hid":  s * jax.random.normal(ks[5], (out_ch,), jnp.float32),
    }
    if stride == 2:
        p["w_down"] = s * jax.random.normal(ks[6], (3, 3, in_ch, out_ch), jnp.float32)
    return p


# ----------------------------- pure-JAX reference -----------------------------

def _conv_ref(x, w_hwio, b, stride=1, padding=0):
    out = jax.lax.conv_general_dilated(
        x, w_hwio, (stride, stride), [(padding, padding), (padding, padding)],
        dimension_numbers=("NCHW", "HWIO", "NCHW"),
        precision=jax.lax.Precision.HIGHEST)
    return out if b is None else out + b.reshape(1, -1, 1, 1)


def ref_fuse_gru_block(x, d, h, params, stride):
    if stride == 2:
        x = jax.nn.relu(_conv_ref(x, params["w_down"], None, stride=2, padding=1))
        d = nearest_downsample_nchw(d, x.shape[2], x.shape[3])
    combined = jnp.concatenate([x, d], axis=1)
    gate = _conv_ref(combined, params["w_gate"], params["b_gate"], padding=1)
    d_hidden = _conv_ref(d, params["w_dh"], params["b_dh"], padding=0)
    hidden = _conv_ref(x * jax.nn.sigmoid(d_hidden), params["w_hid"], params["b_hid"], padding=1)
    hidden = jnp.where(hidden >= 0.0, hidden + 0.5, jax.nn.sigmoid(hidden))
    gate = jax.nn.sigmoid(gate)
    return h + gate * (hidden - h) if h is not None else hidden * gate


# ----------------------------- demo / test -----------------------------

if __name__ == "__main__":
    key = jax.random.PRNGKey(0)
    k_x, k_d, k_h, k_p1, k_p2, k_x2 = jax.random.split(key, 6)

    # Case 1: stride=1 (identity path), no previous hidden state, f32 (tight tolerance).
    N, C, H, W = 2, 8, 16, 16
    x1 = jax.random.normal(k_x, (N, C, H, W), jnp.float32)
    d1 = jax.random.normal(k_d, (N, 1, H, W), jnp.float32)
    p1 = init_params(k_p1, C, C, stride=1)
    out1 = jax.block_until_ready(fuse_gru_block(x1, d1, None, p1, stride=1))
    ref1 = ref_fuse_gru_block(x1, d1, None, p1, stride=1)
    np.testing.assert_allclose(np.asarray(out1), np.asarray(ref1), rtol=1e-4, atol=1e-4)

    # Case 2: stride=2 (down conv + ReLU + nearest interp of d), with previous hidden state.
    Cin, Cout = 4, 8
    x2 = jax.random.normal(k_x2, (N, Cin, H, W), jnp.float32)
    Ho, Wo = (H + 2 - 3) // 2 + 1, (W + 2 - 3) // 2 + 1
    h2 = jax.random.normal(k_h, (N, Cout, Ho, Wo), jnp.float32)
    p2 = init_params(k_p2, Cin, Cout, stride=2)
    out2 = jax.block_until_ready(fuse_gru_block(x2, d1, h2, p2, stride=2))
    ref2 = ref_fuse_gru_block(x2, d1, h2, p2, stride=2)
    np.testing.assert_allclose(np.asarray(out2), np.asarray(ref2), rtol=1e-4, atol=1e-4)

    # Case 3: bf16 MXU inputs (bandwidth optimization); f32 accumulation & elementwise.
    out3 = jax.block_until_ready(
        fuse_gru_block(x2, d1, h2, p2, stride=2, compute_dtype=jnp.bfloat16))
    np.testing.assert_allclose(np.asarray(out3), np.asarray(ref2), rtol=2e-2, atol=2e-2)

    print("KERNEL_OK")
</pallas_src>

<mosaic_0001>
module attributes {stable_mosaic.version = 11 : i64} {
  func.func @_gru_kernel(%arg0: i32, %arg1: memref<1x8x290xf32, #tpu.memory_space<vmem>>, %arg2: memref<1x1x290xf32, #tpu.memory_space<vmem>>, %arg3: memref<8x72xf32, #tpu.memory_space<vmem>>, %arg4: memref<8x9xf32, #tpu.memory_space<vmem>>, %arg5: memref<8x1xf32, #tpu.memory_space<vmem>>, %arg6: memref<8x1xf32, #tpu.memory_space<vmem>>, %arg7: memref<8x1xf32, #tpu.memory_space<vmem>>, %arg8: memref<8x72xf32, #tpu.memory_space<vmem>>, %arg9: memref<8x1xf32, #tpu.memory_space<vmem>>, %arg10: memref<1x8x256xf32, #tpu.memory_space<vmem>>) attributes {dimension_semantics = [#tpu.dimension_semantics<parallel>], iteration_bounds = array<i64: 2>, scalar_prefetch = 0 : i64, scratch_operands = 0 : i64, tpu.core_type = #tpu.core_type<tc>, window_params = [{transform_indices = @transform_0, window_bounds = array<i64: 1, 8, 290>}, {transform_indices = @transform_1, window_bounds = array<i64: 1, 1, 290>}, {pipeline_mode = #tpu.pipeline_mode<synchronous>, transform_indices = @transform_2, window_bounds = array<i64: 8, 72>}, {pipeline_mode = #tpu.pipeline_mode<synchronous>, transform_indices = @transform_3, window_bounds = array<i64: 8, 9>}, {pipeline_mode = #tpu.pipeline_mode<synchronous>, transform_indices = @transform_4, window_bounds = array<i64: 8, 1>}, {pipeline_mode = #tpu.pipeline_mode<synchronous>, transform_indices = @transform_5, window_bounds = array<i64: 8, 1>}, {pipeline_mode = #tpu.pipeline_mode<synchronous>, transform_indices = @transform_6, window_bounds = array<i64: 8, 1>}, {pipeline_mode = #tpu.pipeline_mode<synchronous>, transform_indices = @transform_7, window_bounds = array<i64: 8, 72>}, {pipeline_mode = #tpu.pipeline_mode<synchronous>, transform_indices = @transform_8, window_bounds = array<i64: 8, 1>}, {transform_indices = @transform_9, window_bounds = array<i64: 1, 8, 256>}]} {
    %c0 = arith.constant 0 : index
    %c0_0 = arith.constant 0 : index
    %c0_1 = arith.constant 0 : index
    %0 = vector.load %arg1[%c0, %c0_0, %c0_1] : memref<1x8x290xf32, #tpu.memory_space<vmem>>, vector<1x8x290xf32>
    %1 = vector.shape_cast %0 : vector<1x8x290xf32> to vector<8x290xf32>
    %c0_2 = arith.constant 0 : index
    %c0_3 = arith.constant 0 : index
    %c0_4 = arith.constant 0 : index
    %2 = vector.load %arg2[%c0_2, %c0_3, %c0_4] : memref<1x1x290xf32, #tpu.memory_space<vmem>>, vector<1x1x290xf32>
    %3 = vector.shape_cast %2 : vector<1x1x290xf32> to vector<1x290xf32>
    %c0_5 = arith.constant 0 : index
    %c0_6 = arith.constant 0 : index
    %4 = vector.load %arg6[%c0_5, %c0_6] : memref<8x1xf32, #tpu.memory_space<vmem>>, vector<8x1xf32>
    %5 = vector.broadcast %3 : vector<1x290xf32> to vector<8x290xf32>
    %6 = vector.broadcast %4 : vector<8x1xf32> to vector<8x290xf32>
    %7 = arith.mulf %5, %6 : vector<8x290xf32>
    %c0_7 = arith.constant 0 : index
    %c0_8 = arith.constant 0 : index
    %8 = vector.load %arg7[%c0_7, %c0_8] : memref<8x1xf32, #tpu.memory_space<vmem>>, vector<8x1xf32>
    %9 = vector.broadcast %8 : vector<8x1xf32> to vector<8x290xf32>
    %10 = arith.addf %7, %9 : vector<8x290xf32>
    %11 = arith.negf %10 : vector<8x290xf32>
    %12 = math.exp %11 : vector<8x290xf32>
    %cst = arith.constant 1.000000e+00 : f32
    %13 = vector.broadcast %cst : f32 to vector<8x290xf32>
    %14 = arith.addf %13, %12 : vector<8x290xf32>
    %15 = arith.divf %13, %14 : vector<8x290xf32>
    %16 = arith.mulf %1, %15 : vector<8x290xf32>
    %17 = tpu.iota {dimensions = array<i32: 1>} : vector<1x256xi32>
    %c16_i32 = arith.constant 16 : i32
    %c0_i32 = arith.constant 0 : i32
    %18 = arith.cmpi eq, %c16_i32, %c0_i32 : i32
    %c1_i32 = arith.constant 1 : i32
    %19 = arith.select %18, %c1_i32, %c16_i32 : i32
    %20 = vector.broadcast %19 : i32 to vector<1x256xi32>
    %21 = arith.remsi %17, %20 : vector<1x256xi32>
    %c0_i32_9 = arith.constant 0 : i32
    %22 = vector.broadcast %c0_i32_9 : i32 to vector<1x256xi32>
    %23 = arith.cmpi ne, %21, %22 : vector<1x256xi32>
    %c0_i32_10 = arith.constant 0 : i32
    %24 = vector.broadcast %c0_i32_10 : i32 to vector<1x256xi32>
    %25 = arith.cmpi slt, %21, %24 : vector<1x256xi32>
    %c0_i32_11 = arith.constant 0 : i32
    %26 = arith.cmpi slt, %19, %c0_i32_11 : i32
    %27 = vector.broadcast %26 : i1 to vector<1x256xi1>
    %28 = vector.broadcast %27 : vector<1x256xi1> to vector<1x256xi1>
    %29 = arith.xori %25, %28 : vector<1x256xi1>
    %30 = arith.andi %29, %23 : vector<1x256xi1>
    %31 = vector.broadcast %19 : i32 to vector<1x256xi32>
    %32 = arith.addi %21, %31 : vector<1x256xi32>
    %33 = arith.select %30, %32, %21 : vector<1x256xi1>, vector<1x256xi32>
    %c1_i32_12 = arith.constant 1 : i32
    %34 = vector.broadcast %c1_i32_12 : i32 to vector<1x256xi32>
    %35 = arith.cmpi sge, %33, %34 : vector<1x256xi32>
    %c14_i32 = arith.constant 14 : i32
    %36 = vector.broadcast %c14_i32 : i32 to vector<1x256xi32>
    %37 = arith.cmpi sle, %33, %36 : vector<1x256xi32>
    %c0_13 = arith.constant 0 : index
    %c0_14 = arith.constant 0 : index
    %38 = vector.load %arg4[%c0_13, %c0_14] : memref<8x9xf32, #tpu.memory_space<vmem>>, vector<8x9xf32>
    %cst_15 = arith.constant 0.000000e+00 : f32
    %39 = vector.broadcast %cst_15 : f32 to vector<8x256xf32>
    %40 = vector.extract_strided_slice %1 {offsets = [0, 0], sizes = [8, 256], strides = [1, 1]} : vector<8x290xf32> to vector<8x256xf32>
    %41 = vector.extract_strided_slice %16 {offsets = [0, 0], sizes = [8, 256], strides = [1, 1]} : vector<8x290xf32> to vector<8x256xf32>
    %42 = vector.extract_strided_slice %3 {offsets = [0, 0], sizes = [1, 256], strides = [1, 1]} : vector<1x290xf32> to vector<1x256xf32>
    %c0_i32_16 = arith.constant 0 : i32
    %43 = arith.sitofp %c0_i32_16 : i32 to f32
    %44 = vector.shape_cast %35 : vector<1x256xi1> to vector<1x256xi1>
    %45 = vector.broadcast %44 : vector<1x256xi1> to vector<8x256xi1>
    %46 = vector.broadcast %43 : f32 to vector<8x256xf32>
    %47 = arith.select %45, %40, %46 : vector<8x256xi1>, vector<8x256xf32>
    %c0_i32_17 = arith.constant 0 : i32
    %48 = arith.sitofp %c0_i32_17 : i32 to f32
    %49 = vector.shape_cast %35 : vector<1x256xi1> to vector<1x256xi1>
    %50 = vector.broadcast %49 : vector<1x256xi1> to vector<8x256xi1>
    %51 = vector.broadcast %48 : f32 to vector<8x256xf32>
    %52 = arith.select %50, %41, %51 : vector<8x256xi1>, vector<8x256xf32>
    %c0_i32_18 = arith.constant 0 : i32
    %53 = arith.sitofp %c0_i32_18 : i32 to f32
    %54 = vector.broadcast %53 : f32 to vector<1x256xf32>
    %55 = arith.select %35, %42, %54 : vector<1x256xi1>, vector<1x256xf32>
    %56 = vector.extract_strided_slice %38 {offsets = [0, 0], sizes = [8, 1], strides = [1, 1]} : vector<8x9xf32> to vector<8x1xf32>
    %57 = vector.broadcast %56 : vector<8x1xf32> to vector<8x256xf32>
    %58 = vector.broadcast %55 : vector<1x256xf32> to vector<8x256xf32>
    %59 = arith.mulf %57, %58 : vector<8x256xf32>
    %60 = arith.addf %39, %59 : vector<8x256xf32>
    %61 = vector.extract_strided_slice %1 {offsets = [0, 1], sizes = [8, 256], strides = [1, 1]} : vector<8x290xf32> to vector<8x256xf32>
    %62 = vector.extract_strided_slice %16 {offsets = [0, 1], sizes = [8, 256], strides = [1, 1]} : vector<8x290xf32> to vector<8x256xf32>
    %63 = vector.extract_strided_slice %3 {offsets = [0, 1], sizes = [1, 256], strides = [1, 1]} : vector<1x290xf32> to vector<1x256xf32>
    %64 = vector.extract_strided_slice %38 {offsets = [0, 1], sizes = [8, 1], strides = [1, 1]} : vector<8x9xf32> to vector<8x1xf32>
    %65 = vector.broadcast %64 : vector<8x1xf32> to vector<8x256xf32>
    %66 = vector.broadcast %63 : vector<1x256xf32> to vector<8x256xf32>
    %67 = arith.mulf %65, %66 : vector<8x256xf32>
    %68 = arith.addf %60, %67 : vector<8x256xf32>
    %69 = vector.extract_strided_slice %1 {offsets = [0, 2], sizes = [8, 256], strides = [1, 1]} : vector<8x290xf32> to vector<8x256xf32>
    %70 = vector.extract_strided_slice %16 {offsets = [0, 2], sizes = [8, 256], strides = [1, 1]} : vector<8x290xf32> to vector<8x256xf32>
    %71 = vector.extract_strided_slice %3 {offsets = [0, 2], sizes = [1, 256], strides = [1, 1]} : vector<1x290xf32> to vector<1x256xf32>
    %c0_i32_19 = arith.constant 0 : i32
    %72 = arith.sitofp %c0_i32_19 : i32 to f32
    %73 = vector.shape_cast %37 : vector<1x256xi1> to vector<1x256xi1>
    %74 = vector.broadcast %73 : vector<1x256xi1> to vector<8x256xi1>
    %75 = vector.broadcast %72 : f32 to vector<8x256xf32>
    %76 = arith.select %74, %69, %75 : vector<8x256xi1>, vector<8x256xf32>
    %c0_i32_20 = arith.constant 0 : i32
    %77 = arith.sitofp %c0_i32_20 : i32 to f32
    %78 = vector.shape_cast %37 : vector<1x256xi1> to vector<1x256xi1>
    %79 = vector.broadcast %78 : vector<1x256xi1> to vector<8x256xi1>
    %80 = vector.broadcast %77 : f32 to vector<8x256xf32>
    %81 = arith.select %79, %70, %80 : vector<8x256xi1>, vector<8x256xf32>
    %c0_i32_21 = arith.constant 0 : i32
    %82 = arith.sitofp %c0_i32_21 : i32 to f32
    %83 = vector.broadcast %82 : f32 to vector<1x256xf32>
    %84 = arith.select %37, %71, %83 : vector<1x256xi1>, vector<1x256xf32>
    %85 = vector.extract_strided_slice %38 {offsets = [0, 2], sizes = [8, 1], strides = [1, 1]} : vector<8x9xf32> to vector<8x1xf32>
    %86 = vector.broadcast %85 : vector<8x1xf32> to vector<8x256xf32>
    %87 = vector.broadcast %84 : vector<1x256xf32> to vector<8x256xf32>
    %88 = arith.mulf %86, %87 : vector<8x256xf32>
    %89 = arith.addf %68, %88 : vector<8x256xf32>
    %90 = vector.extract_strided_slice %1 {offsets = [0, 16], sizes = [8, 256], strides = [1, 1]} : vector<8x290xf32> to vector<8x256xf32>
    %91 = vector.extract_strided_slice %16 {offsets = [0, 16], sizes = [8, 256], strides = [1, 1]} : vector<8x290xf32> to vector<8x256xf32>
    %92 = vector.extract_strided_slice %3 {offsets = [0, 16], sizes = [1, 256], strides = [1, 1]} : vector<1x290xf32> to vector<1x256xf32>
    %c0_i32_22 = arith.constant 0 : i32
    %93 = arith.sitofp %c0_i32_22 : i32 to f32
    %94 = vector.shape_cast %35 : vector<1x256xi1> to vector<1x256xi1>
    %95 = vector.broadcast %94 : vector<1x256xi1> to vector<8x256xi1>
    %96 = vector.broadcast %93 : f32 to vector<8x256xf32>
    %97 = arith.select %95, %90, %96 : vector<8x256xi1>, vector<8x256xf32>
    %c0_i32_23 = arith.constant 0 : i32
    %98 = arith.sitofp %c0_i32_23 : i32 to f32
    %99 = vector.shape_cast %35 : vector<1x256xi1> to vector<1x256xi1>
    %100 = vector.broadcast %99 : vector<1x256xi1> to vector<8x256xi1>
    %101 = vector.broadcast %98 : f32 to vector<8x256xf32>
    %102 = arith.select %100, %91, %101 : vector<8x256xi1>, vector<8x256xf32>
    %c0_i32_24 = arith.constant 0 : i32
    %103 = arith.sitofp %c0_i32_24 : i32 to f32
    %104 = vector.broadcast %103 : f32 to vector<1x256xf32>
    %105 = arith.select %35, %92, %104 : vector<1x256xi1>, vector<1x256xf32>
    %106 = vector.extract_strided_slice %38 {offsets = [0, 3], sizes = [8, 1], strides = [1, 1]} : vector<8x9xf32> to vector<8x1xf32>
    %107 = vector.broadcast %106 : vector<8x1xf32> to vector<8x256xf32>
    %108 = vector.broadcast %105 : vector<1x256xf32> to vector<8x256xf32>
    %109 = arith.mulf %107, %108 : vector<8x256xf32>
    %110 = arith.addf %89, %109 : vector<8x256xf32>
    %111 = vector.extract_strided_slice %1 {offsets = [0, 17], sizes = [8, 256], strides = [1, 1]} : vector<8x290xf32> to vector<8x256xf32>
    %112 = vector.extract_strided_slice %16 {offsets = [0, 17], sizes = [8, 256], strides = [1, 1]} : vector<8x290xf32> to vector<8x256xf32>
    %113 = vector.extract_strided_slice %3 {offsets = [0, 17], sizes = [1, 256], strides = [1, 1]} : vector<1x290xf32> to vector<1x256xf32>
    %114 = vector.extract_strided_slice %38 {offsets = [0, 4], sizes = [8, 1], strides = [1, 1]} : vector<8x9xf32> to vector<8x1xf32>
    %115 = vector.broadcast %114 : vector<8x1xf32> to vector<8x256xf32>
    %116 = vector.broadcast %113 : vector<1x256xf32> to vector<8x256xf32>
    %117 = arith.mulf %115, %116 : vector<8x256xf32>
    %118 = arith.addf %110, %117 : vector<8x256xf32>
    %119 = vector.extract_strided_slice %1 {offsets = [0, 18], sizes = [8, 256], strides = [1, 1]} : vector<8x290xf32> to vector<8x256xf32>
    %120 = vector.extract_strided_slice %16 {offsets = [0, 18], sizes = [8, 256], strides = [1, 1]} : vector<8x290xf32> to vector<8x256xf32>
    %121 = vector.extract_strided_slice %3 {offsets = [0, 18], sizes = [1, 256], strides = [1, 1]} : vector<1x290xf32> to vector<1x256xf32>
    %c0_i32_25 = arith.constant 0 : i32
    %122 = arith.sitofp %c0_i32_25 : i32 to f32
    %123 = vector.shape_cast %37 : vector<1x256xi1> to vector<1x256xi1>
    %124 = vector.broadcast %123 : vector<1x256xi1> to vector<8x256xi1>
    %125 = vector.broadcast %122 : f32 to vector<8x256xf32>
    %126 = arith.select %124, %119, %125 : vector<8x256xi1>, vector<8x256xf32>
    %c0_i32_26 = arith.constant 0 : i32
    %127 = arith.sitofp %c0_i32_26 : i32 to f32
    %128 = vector.shape_cast %37 : vector<1x256xi1> to vector<1x256xi1>
    %129 = vector.broadcast %128 : vector<1x256xi1> to vector<8x256xi1>
    %130 = vector.broadcast %127 : f32 to vector<8x256xf32>
    %131 = arith.select %129, %120, %130 : vector<8x256xi1>, vector<8x256xf32>
    %c0_i32_27 = arith.constant 0 : i32
    %132 = arith.sitofp %c0_i32_27 : i32 to f32
    %133 = vector.broadcast %132 : f32 to vector<1x256xf32>
    %134 = arith.select %37, %121, %133 : vector<1x256xi1>, vector<1x256xf32>
    %135 = vector.extract_strided_slice %38 {offsets = [0, 5], sizes = [8, 1], strides = [1, 1]} : vector<8x9xf32> to vector<8x1xf32>
    %136 = vector.broadcast %135 : vector<8x1xf32> to vector<8x256xf32>
    %137 = vector.broadcast %134 : vector<1x256xf32> to vector<8x256xf32>
    %138 = arith.mulf %136, %137 : vector<8x256xf32>
    %139 = arith.addf %118, %138 : vector<8x256xf32>
    %140 = vector.extract_strided_slice %1 {offsets = [0, 32], sizes = [8, 256], strides = [1, 1]} : vector<8x290xf32> to vector<8x256xf32>
    %141 = vector.extract_strided_slice %16 {offsets = [0, 32], sizes = [8, 256], strides = [1, 1]} : vector<8x290xf32> to vector<8x256xf32>
    %142 = vector.extract_strided_slice %3 {offsets = [0, 32], sizes = [1, 256], strides = [1, 1]} : vector<1x290xf32> to vector<1x256xf32>
    %c0_i32_28 = arith.constant 0 : i32
    %143 = arith.sitofp %c0_i32_28 : i32 to f32
    %144 = vector.shape_cast %35 : vector<1x256xi1> to vector<1x256xi1>
    %145 = vector.broadcast %144 : vector<1x256xi1> to vector<8x256xi1>
    %146 = vector.broadcast %143 : f32 to vector<8x256xf32>
    %147 = arith.select %145, %140, %146 : vector<8x256xi1>, vector<8x256xf32>
    %c0_i32_29 = arith.constant 0 : i32
    %148 = arith.sitofp %c0_i32_29 : i32 to f32
    %149 = vector.shape_cast %35 : vector<1x256xi1> to vector<1x256xi1>
    %150 = vector.broadcast %149 : vector<1x256xi1> to vector<8x256xi1>
    %151 = vector.broadcast %148 : f32 to vector<8x256xf32>
    %152 = arith.select %150, %141, %151 : vector<8x256xi1>, vector<8x256xf32>
    %c0_i32_30 = arith.constant 0 : i32
    %153 = arith.sitofp %c0_i32_30 : i32 to f32
    %154 = vector.broadcast %153 : f32 to vector<1x256xf32>
    %155 = arith.select %35, %142, %154 : vector<1x256xi1>, vector<1x256xf32>
    %156 = vector.extract_strided_slice %38 {offsets = [0, 6], sizes = [8, 1], strides = [1, 1]} : vector<8x9xf32> to vector<8x1xf32>
    %157 = vector.broadcast %156 : vector<8x1xf32> to vector<8x256xf32>
    %158 = vector.broadcast %155 : vector<1x256xf32> to vector<8x256xf32>
    %159 = arith.mulf %157, %158 : vector<8x256xf32>
    %160 = arith.addf %139, %159 : vector<8x256xf32>
    %161 = vector.extract_strided_slice %1 {offsets = [0, 33], sizes = [8, 256], strides = [1, 1]} : vector<8x290xf32> to vector<8x256xf32>
    %162 = vector.extract_strided_slice %16 {offsets = [0, 33], sizes = [8, 256], strides = [1, 1]} : vector<8x290xf32> to vector<8x256xf32>
    %163 = vector.extract_strided_slice %3 {offsets = [0, 33], sizes = [1, 256], strides = [1, 1]} : vector<1x290xf32> to vector<1x256xf32>
    %164 = vector.extract_strided_slice %38 {offsets = [0, 7], sizes = [8, 1], strides = [1, 1]} : vector<8x9xf32> to vector<8x1xf32>
    %165 = vector.broadcast %164 : vector<8x1xf32> to vector<8x256xf32>
    %166 = vector.broadcast %163 : vector<1x256xf32> to vector<8x256xf32>
    %167 = arith.mulf %165, %166 : vector<8x256xf32>
    %168 = arith.addf %160, %167 : vector<8x256xf32>
    %169 = vector.extract_strided_slice %1 {offsets = [0, 34], sizes = [8, 256], strides = [1, 1]} : vector<8x290xf32> to vector<8x256xf32>
    %170 = vector.extract_strided_slice %16 {offsets = [0, 34], sizes = [8, 256], strides = [1, 1]} : vector<8x290xf32> to vector<8x256xf32>
    %171 = vector.extract_strided_slice %3 {offsets = [0, 34], sizes = [1, 256], strides = [1, 1]} : vector<1x290xf32> to vector<1x256xf32>
    %c0_i32_31 = arith.constant 0 : i32
    %172 = arith.sitofp %c0_i32_31 : i32 to f32
    %173 = vector.shape_cast %37 : vector<1x256xi1> to vector<1x256xi1>
    %174 = vector.broadcast %173 : vector<1x256xi1> to vector<8x256xi1>
    %175 = vector.broadcast %172 : f32 to vector<8x256xf32>
    %176 = arith.select %174, %169, %175 : vector<8x256xi1>, vector<8x256xf32>
    %c0_i32_32 = arith.constant 0 : i32
    %177 = arith.sitofp %c0_i32_32 : i32 to f32
    %178 = vector.shape_cast %37 : vector<1x256xi1> to vector<1x256xi1>
    %179 = vector.broadcast %178 : vector<1x256xi1> to vector<8x256xi1>
    %180 = vector.broadcast %177 : f32 to vector<8x256xf32>
    %181 = arith.select %179, %170, %180 : vector<8x256xi1>, vector<8x256xf32>
    %c0_i32_33 = arith.constant 0 : i32
    %182 = arith.sitofp %c0_i32_33 : i32 to f32
    %183 = vector.broadcast %182 : f32 to vector<1x256xf32>
    %184 = arith.select %37, %171, %183 : vector<1x256xi1>, vector<1x256xf32>
    %185 = vector.extract_strided_slice %38 {offsets = [0, 8], sizes = [8, 1], strides = [1, 1]} : vector<8x9xf32> to vector<8x1xf32>
    %186 = vector.broadcast %185 : vector<8x1xf32> to vector<8x256xf32>
    %187 = vector.broadcast %184 : vector<1x256xf32> to vector<8x256xf32>
    %188 = arith.mulf %186, %187 : vector<8x256xf32>
    %189 = arith.addf %168, %188 : vector<8x256xf32>
    %190 = tpu.concatenate %47, %61, %76, %97, %111, %126, %147, %161, %176 in 0 : vector<8x256xf32>, vector<8x256xf32>, vector<8x256xf32>, vector<8x256xf32>, vector<8x256xf32>, vector<8x256xf32>, vector<8x256xf32>, vector<8x256xf32>, vector<8x256xf32> -> vector<72x256xf32>
    %191 = tpu.concatenate %52, %62, %81, %102, %112, %131, %152, %162, %181 in 0 : vector<8x256xf32>, vector<8x256xf32>, vector<8x256xf32>, vector<8x256xf32>, vector<8x256xf32>, vector<8x256xf32>, vector<8x256xf32>, vector<8x256xf32>, vector<8x256xf32> -> vector<72x256xf32>
    %c0_34 = arith.constant 0 : index
    %c0_35 = arith.constant 0 : index
    %192 = vector.load %arg3[%c0_34, %c0_35] : memref<8x72xf32, #tpu.memory_space<vmem>>, vector<8x72xf32>
    %cst_36 = arith.constant dense<0.000000e+00> : vector<8x256xf32>
    %193 = tpu.matmul %192, %190, %cst_36 {dimension_numbers = #tpu.dot_dimension_numbers<[1], [0], [0], [1], [0, 0, 1, 1], [], []>} : vector<8x72xf32>, vector<72x256xf32>, vector<8x256xf32> -> vector<8x256xf32>
    %194 = arith.addf %189, %193 : vector<8x256xf32>
    %c0_37 = arith.constant 0 : index
    %c0_38 = arith.constant 0 : index
    %195 = vector.load %arg5[%c0_37, %c0_38] : memref<8x1xf32, #tpu.memory_space<vmem>>, vector<8x1xf32>
    %196 = vector.broadcast %195 : vector<8x1xf32> to vector<8x256xf32>
    %197 = arith.addf %194, %196 : vector<8x256xf32>
    %198 = arith.negf %197 : vector<8x256xf32>
    %199 = math.exp %198 : vector<8x256xf32>
    %cst_39 = arith.constant 1.000000e+00 : f32
    %200 = vector.broadcast %cst_39 : f32 to vector<8x256xf32>
    %201 = arith.addf %200, %199 : vector<8x256xf32>
    %202 = arith.divf %200, %201 : vector<8x256xf32>
    %c0_40 = arith.constant 0 : index
    %c0_41 = arith.constant 0 : index
    %203 = vector.load %arg8[%c0_40, %c0_41] : memref<8x72xf32, #tpu.memory_space<vmem>>, vector<8x72xf32>
    %cst_42 = arith.constant dense<0.000000e+00> : vector<8x256xf32>
    %204 = tpu.matmul %203, %191, %cst_42 {dimension_numbers = #tpu.dot_dimension_numbers<[1], [0], [0], [1], [0, 0, 1, 1], [], []>} : vector<8x72xf32>, vector<72x256xf32>, vector<8x256xf32> -> vector<8x256xf32>
    %c0_43 = arith.constant 0 : index
    %c0_44 = arith.constant 0 : index
    %205 = vector.load %arg9[%c0_43, %c0_44] : memref<8x1xf32, #tpu.memory_space<vmem>>, vector<8x1xf32>
    %206 = vector.broadcast %205 : vector<8x1xf32> to vector<8x256xf32>
    %207 = arith.addf %204, %206 : vector<8x256xf32>
    %cst_45 = arith.constant 0.000000e+00 : f32
    %208 = vector.broadcast %cst_45 : f32 to vector<8x256xf32>
    %209 = arith.cmpf oge, %207, %208 : vector<8x256xf32>
    %cst_46 = arith.constant 5.000000e-01 : f32
    %210 = vector.broadcast %cst_46 : f32 to vector<8x256xf32>
    %211 = arith.addf %207, %210 : vector<8x256xf32>
    %212 = arith.negf %207 : vector<8x256xf32>
    %213 = math.exp %212 : vector<8x256xf32>
    %cst_47 = arith.constant 1.000000e+00 : f32
    %214 = vector.broadcast %cst_47 : f32 to vector<8x256xf32>
    %215 = arith.addf %214, %213 : vector<8x256xf32>
    %216 = arith.divf %214, %215 : vector<8x256xf32>
    %217 = arith.select %209, %211, %216 : vector<8x256xi1>, vector<8x256xf32>
    %218 = arith.mulf %217, %202 : vector<8x256xf32>
    %c0_48 = arith.constant 0 : index
    %c0_49 = arith.constant 0 : index
    %c0_50 = arith.constant 0 : index
    %219 = vector.load %arg10[%c0_48, %c0_49, %c0_50] : memref<1x8x256xf32, #tpu.memory_space<vmem>>, vector<1x8x256xf32>
    %220 = vector.shape_cast %219 : vector<1x8x256xf32> to vector<8x256xf32>
    %221 = vector.shape_cast %218 : vector<8x256xf32> to vector<1x8x256xf32>
    tpu.vector_store %arg10[%c0_48, %c0_49, %c0_50], %221 {strides = array<i32>} : memref<1x8x256xf32, #tpu.memory_space<vmem>>, vector<1x8x256xf32>,
    return
  }
  func.func @transform_0(%arg0: i32) -> (i32, i32, i32) {
    %c0_i32 = arith.constant 0 : i32
    %c0_i32_0 = arith.constant 0 : i32
    %c0_i32_1 = arith.constant 0 : i32
    return %arg0, %c0_i32, %c0_i32_0 : i32, i32, i32
  }
  func.func @transform_1(%arg0: i32) -> (i32, i32, i32) {
    %c0_i32 = arith.constant 0 : i32
    %c0_i32_0 = arith.constant 0 : i32
    %c0_i32_1 = arith.constant 0 : i32
    return %arg0, %c0_i32, %c0_i32_0 : i32, i32, i32
  }
  func.func @transform_2(%arg0: i32) -> (i32, i32) {
    %c0_i32 = arith.constant 0 : i32
    %c0_i32_0 = arith.constant 0 : i32
    %c0_i32_1 = arith.constant 0 : i32
    return %c0_i32, %c0_i32_0 : i32, i32
  }
  func.func @transform_3(%arg0: i32) -> (i32, i32) {
    %c0_i32 = arith.constant 0 : i32
    %c0_i32_0 = arith.constant 0 : i32
    %c0_i32_1 = arith.constant 0 : i32
    return %c0_i32, %c0_i32_0 : i32, i32
  }
  func.func @transform_4(%arg0: i32) -> (i32, i32) {
    %c0_i32 = arith.constant 0 : i32
    %c0_i32_0 = arith.constant 0 : i32
    %c0_i32_1 = arith.constant 0 : i32
    return %c0_i32, %c0_i32_0 : i32, i32
  }
  func.func @transform_5(%arg0: i32) -> (i32, i32) {
    %c0_i32 = arith.constant 0 : i32
    %c0_i32_0 = arith.constant 0 : i32
    %c0_i32_1 = arith.constant 0 : i32
    return %c0_i32, %c0_i32_0 : i32, i32
  }
  func.func @transform_6(%arg0: i32) -> (i32, i32) {
    %c0_i32 = arith.constant 0 : i32
    %c0_i32_0 = arith.constant 0 : i32
    %c0_i32_1 = arith.constant 0 : i32
    return %c0_i32, %c0_i32_0 : i32, i32
  }
  func.func @transform_7(%arg0: i32) -> (i32, i32) {
    %c0_i32 = arith.constant 0 : i32
    %c0_i32_0 = arith.constant 0 : i32
    %c0_i32_1 = arith.constant 0 : i32
    return %c0_i32, %c0_i32_0 : i32, i32
  }
  func.func @transform_8(%arg0: i32) -> (i32, i32) {
    %c0_i32 = arith.constant 0 : i32
    %c0_i32_0 = arith.constant 0 : i32
    %c0_i32_1 = arith.constant 0 : i32
    return %c0_i32, %c0_i32_0 : i32, i32
  }
  func.func @transform_9(%arg0: i32) -> (i32, i32, i32) {
    %c0_i32 = arith.constant 0 : i32
    %c0_i32_0 = arith.constant 0 : i32
    %c0_i32_1 = arith.constant 0 : i32
    return %arg0, %c0_i32, %c0_i32_0 : i32, i32, i32
  }
}

</mosaic_0001>

<bundles_post_ra>
// kernel: tpu_custom_call.1
= control target key start
LH: loop header
LB: loop body
LE: loop exit
PB: predicated region body
PF: predicated region fallthrough
CT: control target
= control target key end

     0   :  { %14 = vsyncpa [#allocation3], 0  ;;  %s1995_s0 = inlined_call_operand.hbm [shape: f32[2,8,290], index: 0, kind: input, shape index: {}]   ;;  %s1996_s1 = inlined_call_operand.vmem [shape: f32[2,1,290], index: 1, kind: input, shape index: {}]   ;;  %s1997_s2 = inlined_call_operand.vmem [shape: f32[8,72], index: 2, kind: input, shape index: {}]   ;;  %s1998_s3 = inlined_call_operand.vmem [shape: f32[8,9], index: 3, kind: input, shape index: {}]   ;;  %s1999_s4 = inlined_call_operand.vmem [shape: f32[8,1], index: 4, kind: input, shape index: {}]   ;;  %s2000_s5 = inlined_call_operand.vmem [shape: f32[8,1], index: 5, kind: input, shape index: {}]   ;;  %s2001_s6 = inlined_call_operand.vmem [shape: f32[8,1], index: 6, kind: input, shape index: {}]   ;;  %s2002_s7 = inlined_call_operand.vmem [shape: f32[8,72], index: 7, kind: input, shape index: {}]   ;;  %s2003_s8 = inlined_call_operand.vmem [shape: f32[8,1], index: 8, kind: input, shape index: {}]   ;;  %s2004_s9 = inlined_call_operand.hbm [shape: f32[2,8,256], index: 9, kind: output, shape index: {}]  }
   0x1   :  { %16 = vsyncpa [#allocation3 + $0x1], 0 }
   0x2   :  { %17 = vsyncpa [#allocation4], 0 }
   0x3   :  { %19 = vsyncpa [#allocation4 + $0x1], 0  ;;  %s1503_s30 = smov 0   ;;  %s1505_s10 = smov 0  }
   0x4   :  { %s1507_s11 = smov 0   ;;  %s1509_s12 = smov 0  }
   0x5 LB: > { %2010 = sst [smem:[#allocation8_spill]] %s1427_s11  ;;  %s1524_s13 = sadd.s32 4294967295, %s1431_s12   ;;  %s1431_s12 = sphi %s1509_s12, %s2031_s12   ;;  %s1427_s11 = sphi %s1507_s11, %s2033_s11   ;;  %s1423_s10 = sphi %s1505_s10, %s2035_s10   ;;  %s1419_s30 = sphi %s1503_s30, %s2034_s30  }
   0x6   : > { %s1186_s14 = sadd.s32 4294967294, %s1431_s12   ;;  %s1528_s15 = sadd.s32 1, %s1431_s12  }
   0x7   : > { %2011 = sst [smem:[#allocation9_spill]] %s1528_s15  ;;  %s32_s16 = sadd.s32 1, %s1427_s11 }
   0x8   : > { %s29_s17 = ssub.s32 %s1431_s12, %s1528_s15  ;;  %p39_p0 = scmp.ne.s32.totalorder %s1427_s11, %s1423_s10 }
   0x9   : > { %p30_p1 = scmp.eq.s32.totalorder %s29_s17, 0  ;;  %p40_p2 = scmp.eq.s32.totalorder %s1431_s12, 0 }
   0xa   : > { %p45_p3 = scmp.ne.s32.totalorder %s1423_s10, %s1419_s30  ;;  %p46_p4 = scmp.eq.s32.totalorder %s1524_s13, 0 }
   0xb   : > { %s1540_s18 = scalar_select %p30_p1, %s1427_s11, %s32_s16  }
   0xc   : > { %p41_p5 = por %p40_p2, %p39_p0  ;;  %p1542_p6 = por %p46_p4, %p45_p3 }
   0xd   : > { %2012 = sst [smem:[#allocation10_spill]] %s1540_s18  ;;  %p242_p7 = scmp.eq.s32.totalorder %s1524_s13, 1 }
   0xe   : > { %s2013_s19 = scalar_select %p1542_p6, 1, 0 }
   0xf   : > { %p248_p8 = scmp.eq.s32.totalorder %s1186_s14, 1  ;;  %p1247_p10 = scmp.lt.s32.totalorder %s1431_s12, 2 }
  0x10   : > { %p1549_p11 = por %p242_p7, %p39_p0  ;;  %s289_s22 = sand.u32 1, %s1427_s11  }
  0x11   : > { %p1553_p12 = por %p248_p8, %p45_p3  ;;  %s1232_s23 = smul.u32 384, %s1431_s12 }
  0x12   : > { %s2014_s20 = scalar_select %p1549_p11, 1, 0 }
  0x13   : > { %s2015_s21 = scalar_select %p1553_p12, 1, 0 }
  0x14   : > { %s1231_s24 = smul.u32 24, %s289_s22  ;;  %s1562_s27 = scalar_lea.hbm %s1995_s0, %s1232_s23 }
  0x15   : > { %p1564_p13 = pnand %p1247_p10, %p41_p5  ;;  %s290_s16 = scalar_lea.sflag [#allocation3], %s289_s22 }
  0x16   : > { %s293_s29 = scalar_lea.vmem [#allocation2], %s1231_s24  ;;  %s1339_s17 = scalar_lea.hbm %s1562_s27, 384 }
  0x17   : > { %s301_s14 = sshll.u32 %s293_s29, 4  ;;  %p1340_p2 = scmp.ne.s32.totalorder %s1562_s27, %s1339_s17  ;;  %s302_s14 = int_to_ptr.vmem [resolvable:$true] %s301_s14 }
  0x18   : > { %p1341_p3 = pneg %p1564_p13  ;;  %s1344_s26 = scalar_lea.hbm %s1995_s0, 768 }
  0x19   : > { %p1345_p5 = scmp.lt.s32.totalorder %s1562_s27, %s1995_s0  ;;  %p1346_p8 = scmp.lt.s32.totalorder %s1344_s26, %s1339_s17 }
  0x1a   : > { %p1342_p4 = pnand %p1341_p3, %p1340_p2 }
  0x1b   : > { %p1347_p10 = por %p1346_p8, %p1345_p5 }
  0x1c   : > { %p1343_p7 = pneg %p1342_p4 }
  0x1e   : > { %p1348_p9 = pnand %p1347_p10, %p1343_p7 }
  0x20   : > { %1351 = shalt.err (!%p1348_p9)
}
  0x21   : > { %s1352_s24 = scalar_lea.vmem %s302_s14, 384  ;;  %s1433_s22 = smov [#allocation2]  }
  0x22   : > { %p1353_p0 = scmp.ne.s32.totalorder %s302_s14, %s1352_s24  ;;  %s1357_s29 = sshll.u32 %s1433_s22, 4  ;;  %s1358_s29 = int_to_ptr.vmem [resolvable:$false] %s1357_s29 }
  0x23   : > { %s1359_s15 = scalar_lea.vmem %s1358_s29, 768  ;;  %p1360_p2 = scmp.lt.s32.totalorder %s302_s14, %s1358_s29 }
  0x24   : > { %p1355_p1 = pnand %p1353_p0, %p1341_p3  ;;  %p1361_p4 = scmp.lt.s32.totalorder %s1359_s15, %s1352_s24 }
  0x26   : > { %p1356_p12 = pneg %p1355_p1  ;;  %p1362_p11 = por %p1361_p4, %p1360_p2 }
  0x28   : > { %p1363_p6 = pnand %p1362_p11, %p1356_p12 }
  0x2a   : > { %1366 = shalt.err (!%p1363_p6)
}
  0x2b   : > { %1242 = dma.hbm_to_vmem [thread:$0]  (!%p1564_p13), %s1562_s27, 384, %s302_s14, %s290_s16  }
  0x2c   : > { %p2017_p9 = scmp.lt.s32.totalorder %s1431_s12, 3  ;;  %p2018_p7 = scmp.ge.s32.totalorder %s1431_s12, 1 }
  0x2e   : > { %p314_p5 = pnand %p2018_p7, %p2017_p9 }
  0x2f   : > { %s1589_s11 = sand.u32 (!%p314_p5), 1, %s1423_s10   ;;  %p2019_p6 = scmp.ne.s32.totalorder (!%p314_p5), %s2013_s19, 0 }
  0x30   : > { %317 = sbr.rel (%p314_p5) target bundleno = 645 (0x285), region = 56  ;;  %s320_s18 = scalar_lea.sflag (!%p314_p5), [#allocation3], %s1589_s11 }
  0x31   : > { %s1233_s15 = smul.u32 (!%p314_p5), 24, %s1589_s11 }
  0x33   : > { %s323_s17 = scalar_lea.vmem (!%p314_p5), [#allocation2], %s1233_s15 }
  0x35   : > { %1410 = dma.done.wait (%p2019_p6), %s320_s18, 384  }
  0x36   : > { %1412 = vsyncadd (%p2019_p6), %s320_s18, 4294966912  ;;  %v1434_v0 = vmov 0   ;;  %v370_v1 = vld [vmem:[%s2000_s5] sm:$0xff]  ;;  %s1435_s23 = smov 94   ;;  %v1608_v4 = vld [vmem:[%s323_s17 + $0x10] sm:$0xff]  ;;  %s1436_s19 = smov 95   ;;  %v372_v8 = vlaneseq }
  0x37   : > { %1299 = vset.pattern.permute.xlu0 %v1434_v0  ;;  %v1601_v2 = vld [vmem:[%s323_s17 + $0x8] sm:$0xff]  ;;  %v1610_v5 = vld [vmem:[%s323_s17] sm:$0xff]  ;;  %s1437_s25 = smov 96   ;;  %s1438_s26 = smov 110   ;;  %v1443_v6 = vmov 1   ;;  %v1444_v7 = vmov 4  }
  0x38   : > { %389 = vperm.xlu0 %1299, %v370_v1   ;;  %v395_v3 = vld [vmem:[%s2001_s6] sm:$0xff]  ;;  %777 = vrot.lane.b32.xlu1 %v1601_v2, %s1435_s23  ;;  %s1439_s24 = smov 111   ;;  %s1440_s22 = smov 112   ;;  %v426_v9 = vand.u32 127, %v372_v8  ;;  %v373_v11 = vshrl.u32 %v372_v8, 7  ;;  %vm781_vm0 = vcmask 769024  }
  0x39   : > { %s1441_s29 = smov 126   ;;  %s1442_s15 = smov 127   ;;  %1301 = vset.pattern.permute.xlu1 %v1444_v7  ;;  %vm768_vm3 = vcmask 777216   ;;  %vm705_vm4 = vcmask 785408   ;;  %vm652_vm7 = vcmask 900096   ;;  %vm639_vm8 = vcmask 908288  }
  0x3a   : > { %p362_p11 = scmp.lt.s32.totalorder %s1524_s13, 1  ;;  %v427_v10 = vadd.s32 128, %v426_v9  ;;  %v1663_v14 = vsub.s32 0, %v373_v11  ;;  %v378_v15 = vsub.s32 1, %v373_v11  ;;  %v382_v16 = vsub.s32 2, %v373_v11  ;;  %s1090_s27 = scalar_lea.sflag [#allocation4], %s1589_s11 }
  0x3b   : > { %v432_v25 = vand.u32 15, %v426_v9  ;;  %vm576_vm9 = vcmask 916480   ;;  %vm520_vm10 = vcmask 1031168   ;;  %vm500_vm11 = vcmask 1039360   ;;  %p2028_p13 = scmp.ne.s32.totalorder %s2014_s20, 0 }
  0x3c   : > { %398 = vperm.xlu0 %1299, %v395_v3   ;;  %779 = vrot.lane.b32.xlu1 %v1608_v4, %s1435_s23  ;;  %s363_s18 = scalar_select %p362_p11, %s1524_s13, 1  ;;  %v439_v12 = vand.u32 15, %v427_v10  ;;  %vm889_vm12 = vcmask 588800  }
  0x3d   : > { %vm1682_vm2 = vcmp.le.s32.totalorder %v432_v25, 14  ;;  %vm1698_vm6 = vcmp.ge.s32.totalorder %v432_v25, 1 }
  0x3e   : > { %s1234_s17 = smul.u32 3, %s363_s18  ;;  %vm1665_vm1 = vcmp.le.s32.totalorder %v439_v12, 14  ;;  %vm1691_vm5 = vcmp.ge.s32.totalorder %v439_v12, 1 }
  0x40   : > { %775 = vrot.lane.b32.xlu0 %v1610_v5, %s1435_s23  ;;  %852 = vrot.lane.b32.xlu1 %v1608_v4, %s1436_s19  ;;  %s365_s14 = scalar_lea.vmem %s1996_s1, %s1234_s17 }
  0x41   : > { %1300 = vset.pattern.permute.xlu0 %v1443_v6  ;;  %v369_v18 = vld [vmem:[%s365_s14] sm:$0x7] }
  0x42   : > { %v1673_v21 = vrot.slane %v369_v18, %v1663_v14  ;;  %v1675_v22 = vrot.slane %v369_v18, %v378_v15  ;;  %v1677_v23 = vrot.slane %v369_v18, %v382_v16 }
  0x44   : > { %850 = vrot.lane.b32.xlu0 %v1601_v2, %s1436_s19  ;;  %701 = vrot.lane.b32.xlu1 %v1601_v2, %s1437_s25 }
  0x48   : > { %848 = vrot.lane.b32.xlu0 %v1610_v5, %s1436_s19  ;;  %648 = vrot.lane.b32.xlu1 %v1601_v2, %s1438_s26 }
  0x4c   : > { %703 = vrot.lane.b32.xlu0 %v1608_v4, %s1437_s25  ;;  %842 = vrot.lane.b32.xlu1 %v1608_v4, %s1439_s24 }
  0x50   : > { %699 = vrot.lane.b32.xlu0 %v1610_v5, %s1437_s25  ;;  %572 = vrot.lane.b32.xlu1 %v1601_v2, %s1440_s22 }
  0x54   : > { %650 = vrot.lane.b32.xlu0 %v1608_v4, %s1438_s26  ;;  %516 = vrot.lane.b32.xlu1 %v1601_v2, %s1441_s29 }
  0x58   : > { %646 = vrot.lane.b32.xlu0 %v1610_v5, %s1438_s26  ;;  %832 = vrot.lane.b32.xlu1 %v1608_v4, %s1442_s15 }
  0x5c   : > { %840 = vrot.lane.b32.xlu0 %v1601_v2, %s1439_s24 }
  0x60   : > { %838 = vrot.lane.b32.xlu0 %v1610_v5, %s1439_s24 }
  0x64   : > { %574 = vrot.lane.b32.xlu0 %v1608_v4, %s1440_s22 }
  0x68   : > { %570 = vrot.lane.b32.xlu0 %v1610_v5, %s1440_s22 }
  0x6c   : > { %518 = vrot.lane.b32.xlu0 %v1608_v4, %s1441_s29 }
  0x70   : > { %514 = vrot.lane.b32.xlu0 %v1610_v5, %s1441_s29 }
  0x74   : > { %830 = vrot.lane.b32.xlu0 %v1601_v2, %s1442_s15 }
  0x78   : > { %828 = vrot.lane.b32.xlu0 %v1610_v5, %s1442_s15 }
  0xaa   : > { %v778_v13 = vpop.permute.xlu1 %777 }
  0xae   : > { %v780_v19 = vpop.permute.xlu1 %779 }
  0xaf   : > { %v783_v20 = vsel %vm781_vm0, %v778_v13, %v780_v19 }
  0xb0   : > { %1195 = vmatprep.subr.msk.mxu0 %vm1665_vm1, %v783_v20  ;;  %v1445_v20 = vmov 0.0  }
  0xb1   : > { %957 = vmatprep.mubr.f32.mxu0 %v1445_v20  ;;  %1060 = vmatprep.mubr.f32.mxu1 %v1445_v20 }
  0xb2   : > { %v853_v39 = vpop.permute.xlu1 %852 }
  0xb3   : > { %v390_v24 = vpop.permute.xlu0 %389 }
  0xb4   : > { %v392_v26 = vmul.f32 %v390_v24, %v1673_v21  ;;  %v393_v27 = vmul.f32 %v390_v24, %v1675_v22  ;;  %v394_v28 = vmul.f32 %v390_v24, %v1677_v23 }
  0xb6   : > { %v702_v44 = vpop.permute.xlu1 %701 }
  0xb7   : > { %v399_v29 = vpop.permute.xlu0 %398 }
  0xb8   : > { %v401_v30 = vadd.f32 %v399_v29, %v392_v26  ;;  %v402_v31 = vadd.f32 %v399_v29, %v393_v27  ;;  %v403_v32 = vadd.f32 %v399_v29, %v394_v28 }
  0xba   : > { %v1192_v34 = vmul.f32 -1.442695, %v401_v30  ;;  %v1193_v35 = vmul.f32 -1.442695, %v402_v31  ;;  %v1194_v36 = vmul.f32 -1.442695, %v403_v32  ;;  %v649_v57 = vpop.permute.xlu1 %648 }
  0xbb   : > { %v776_v37 = vpop.permute.xlu0 %775 }
  0xbc   : > { %1311 = vpow2.f32 %v1192_v34  ;;  %v782_v38 = vsel %vm781_vm0, %v776_v37, %v778_v13  ;;  %v888_v34 = vld [vmem:[%s1997_s2] sm:$0xff]  ;;  %v1449_v37 = vmov 2  }
  0xbd   : > { %1313 = vpow2.f32 %v1193_v35  ;;  %1196 = vmatpush1.msk.msra.mxu0 %vm1682_vm2, %v782_v38  ;;  %v1771_v35 = vld [vmem:[%s1998_s3] sm:$0xff]  ;;  %v1450_v38 = vmov 6  }
  0xbe   : > { %1315 = vpow2.f32 %v1194_v36  ;;  %v843_v62 = vpop.permute.xlu1 %842  ;;  %v1448_v36 = vmov 7  }
  0xbf   : > { %v851_v40 = vpop.permute.xlu0 %850 }
  0xc0   : > { %v855_v41 = vsel %vm768_vm3, %v851_v40, %v853_v39 }
  0xc1   : > { %909 = vmatprep.subr.mxu0 %v855_v41 }
  0xc2   : > { %v573_v12 = vpop.permute.xlu1 %572 }
  0xc3   : > { %v849_v42 = vpop.permute.xlu0 %848 }
  0xc4   : > { %v854_v43 = vsel %vm768_vm3, %v849_v42, %v851_v40 }
  0xc5   : > { %910 = vmatpush1.msra.mxu0 %v854_v43 }
  0xc6   : > { %v517_v19 = vpop.permute.xlu1 %516 }
  0xc7   : > { %v704_v46 = vpop.permute.xlu0 %703 }
  0xc8   : > { %v707_v47 = vsel %vm705_vm4, %v702_v44, %v704_v46 }
  0xc9   : > { %v1312_v48 = vpop.eup %1311  ;;  %1197 = vmatprep.subr.msk.mxu0 %vm1691_vm5, %v707_v47 }
  0xca   : > { %v1314_v49 = vpop.eup %1313  ;;  %v413_v52 = vadd.f32 1.0, %v1312_v48  ;;  %v833_v28 = vpop.permute.xlu1 %832 }
  0xcb   : > { %v1316_v51 = vpop.eup %1315  ;;  %v414_v53 = vadd.f32 1.0, %v1314_v49  ;;  %v700_v54 = vpop.permute.xlu0 %699 }
  0xcc   : > { %v415_v55 = vadd.f32 1.0, %v1316_v51  ;;  %v706_v56 = vsel %vm705_vm4, %v700_v54, %v702_v44 }
  0xcd   : > { %1317 = vrcp.f32 %v414_v53  ;;  %1198 = vmatpush1.msk.msra.mxu0 %vm1698_vm6, %v706_v56 }
  0xce   : > { %1319 = vrcp.f32 %v415_v55 }
  0xcf   : > { %1321 = vrcp.f32 %v413_v52  ;;  %v651_v58 = vpop.permute.xlu0 %650 }
  0xd0   : > { %v654_v59 = vsel %vm652_vm7, %v649_v57, %v651_v58 }
  0xd1   : > { %1199 = vmatprep.subr.msk.mxu0 %vm1665_vm1, %v654_v59 }
  0xd3   : > { %v647_v60 = vpop.permute.xlu0 %646 }
  0xd4   : > { %v653_v61 = vsel %vm652_vm7, %v647_v60, %v649_v57 }
  0xd5   : > { %1200 = vmatpush1.msk.msra.mxu0 %vm1682_vm2, %v653_v61 }
  0xd7   : > { %v841_v63 = vpop.permute.xlu0 %840 }
  0xd8   : > { %v845_v1 = vsel %vm639_vm8, %v841_v63, %v843_v62 }
  0xd9   : > { %915 = vmatprep.subr.mxu0 %v845_v1 }
  0xda   : > { %v1318_v3 = vpop.eup %1317 }
  0xdb   : > { %v1320_v6 = vpop.eup %1319  ;;  %v1713_v7 = vmul.f32 %v1318_v3, %v1601_v2  ;;  %v839_v8 = vpop.permute.xlu0 %838 }
  0xdc   : > { %v1322_v9 = vpop.eup %1321  ;;  %v424_v10 = vmul.f32 %v1320_v6, %v1608_v4  ;;  %v844_v11 = vsel %vm639_vm8, %v839_v8, %v841_v63 }
  0xdd   : > { %790 = vrot.lane.b32.xlu1 %v1713_v7, %s1435_s23  ;;  %916 = vmatpush1.msra.mxu0 %v844_v11  ;;  %v1721_v13 = vmul.f32 %v1322_v9, %v1610_v5 }
  0xde   : > { %792 = vrot.lane.b32.xlu0 %v424_v10, %s1435_s23 }
  0xdf   : > { %v575_v15 = vpop.permute.xlu0 %574 }
  0xe0   : > { %v578_v16 = vsel %vm576_vm9, %v573_v12, %v575_v15 }
  0xe1   : > { %788 = vrot.lane.b32.xlu1 %v1721_v13, %s1435_s23  ;;  %1201 = vmatprep.subr.msk.mxu0 %vm1691_vm5, %v578_v16 }
  0xe2   : > { %882 = vrot.lane.b32.xlu0 %v424_v10, %s1436_s19 }
  0xe3   : > { %v571_v4 = vpop.permute.xlu0 %570 }
  0xe4   : > { %v577_v18 = vsel %vm576_vm9, %v571_v4, %v573_v12 }
  0xe5   : > { %880 = vrot.lane.b32.xlu1 %v1713_v7, %s1436_s19  ;;  %1202 = vmatpush1.msk.msra.mxu0 %vm1698_vm6, %v577_v18 }
  0xe6   : > { %716 = vrot.lane.b32.xlu0 %v424_v10, %s1437_s25 }
  0xe7   : > { %v519_v24 = vpop.permute.xlu0 %518 }
  0xe8   : > { %v522_v25 = vsel %vm520_vm10, %v517_v19, %v519_v24 }
  0xe9   : > { %878 = vrot.lane.b32.xlu1 %v1721_v13, %s1436_s19  ;;  %1203 = vmatprep.subr.msk.mxu0 %vm1665_vm1, %v522_v25 }
  0xea   : > { %663 = vrot.lane.b32.xlu0 %v424_v10, %s1438_s26 }
  0xeb   : > { %v515_v26 = vpop.permute.xlu0 %514 }
  0xec   : > { %v521_v27 = vsel %vm520_vm10, %v515_v26, %v517_v19 }
  0xed   : > { %714 = vrot.lane.b32.xlu1 %v1713_v7, %s1437_s25  ;;  %1204 = vmatpush1.msk.msra.mxu0 %vm1682_vm2, %v521_v27  ;;  %v1451_v27 = vmov 8  }
  0xee   : > { %872 = vrot.lane.b32.xlu0 %v424_v10, %s1439_s24 }
  0xef   : > { %v831_v29 = vpop.permute.xlu0 %830 }
  0xf0   : > { %v835_v30 = vsel %vm500_vm11, %v831_v29, %v833_v28 }
  0xf1   : > { %712 = vrot.lane.b32.xlu1 %v1721_v13, %s1437_s25  ;;  %921 = vmatprep.subr.mxu0 %v835_v30 }
  0xf2   : > { %587 = vrot.lane.b32.xlu0 %v424_v10, %s1440_s22 }
  0xf3   : > { %v829_v31 = vpop.permute.xlu0 %828 }
  0xf4   : > { %v834_v32 = vsel %vm500_vm11, %v829_v31, %v831_v29 }
  0xf5   : > { %661 = vrot.lane.b32.xlu1 %v1713_v7, %s1438_s26  ;;  %922 = vmatpush1.msra.mxu0 %v834_v32  ;;  %v986_v32 = vld [vmem:[%s2002_s7] sm:$0xff] }
  0xf6   : > { %534 = vrot.lane.b32.xlu0 %v424_v10, %s1441_s29  ;;  %1205 = vmatprep.subr.msk.mxu0 %vm1691_vm5, %v1601_v2  ;;  %v1446_v2 = vmov 3  }
  0xf7   : > { %1206 = vmatpush1.msk.msra.mxu0 %vm1698_vm6, %v1610_v5  ;;  %v1447_v5 = vmov 5  }
  0xf8   : > { %1207 = vmatmul.mubr.msk.f32.vlgmr.msra.gmra.mxu0 %vm889_vm12, %v888_v34 }
  0xf9   : > { %659 = vrot.lane.b32.xlu1 %v1721_v13, %s1438_s26 }
  0xfa   : > { %862 = vrot.lane.b32.xlu0 %v424_v10, %s1442_s15 }
  0xfd   : > { %870 = vrot.lane.b32.xlu1 %v1713_v7, %s1439_s24 }
  0xfe   : > { %485 = vperm.xlu0 %1300, %v1771_v35  }
 0x101   : > { %868 = vrot.lane.b32.xlu1 %v1721_v13, %s1439_s24 }
 0x102   : > { %1303 = vset.pattern.permute.xlu0 %v1434_v0 }
 0x103   : > { %469 = vperm.xlu0 %1303, %v1771_v35  }
 0x105   : > { %585 = vrot.lane.b32.xlu1 %v1713_v7, %s1440_s22 }
 0x107   : > { %544 = vrot.lane.b32.xlu0 %v1675_v22, %s1441_s29 }
 0x108   : > { %1305 = vset.pattern.permute.xlu0 %v1446_v2 }
 0x109   : > { %583 = vrot.lane.b32.xlu1 %v1721_v13, %s1440_s22 }
 0x10b   : > { %608 = vperm.xlu0 %1305, %v1771_v35  }
 0x10d   : > { %532 = vrot.lane.b32.xlu1 %v1713_v7, %s1441_s29 }
 0x10f   : > { %599 = vrot.lane.b32.xlu0 %v1677_v23, %s1440_s22 }
 0x110   : > { %1306 = vset.pattern.permute.xlu0 %v1447_v5 }
 0x111   : > { %530 = vrot.lane.b32.xlu1 %v1721_v13, %s1441_s29 }
 0x115   : > { %860 = vrot.lane.b32.xlu1 %v1713_v7, %s1442_s15 }
 0x119   : > { %858 = vrot.lane.b32.xlu1 %v1721_v13, %s1442_s15 }
 0x11d   : > { %624 = vperm.xlu1 %1301, %v1771_v35  }
 0x121   : > { %1302 = vset.pattern.permute.xlu1 %v1448_v36 }
 0x122   : > { %753 = vperm.xlu1 %1302, %v1771_v35  }
 0x126   : > { %1304 = vset.pattern.permute.xlu1 %v1449_v37 }
 0x127   : > { %555 = vperm.xlu1 %1304, %v1771_v35  }
 0x12b   : > { %542 = vrot.lane.b32.xlu1 %v1673_v21, %s1441_s29 }
 0x12c   : > { %1307 = vset.pattern.permute.xlu1 %v1450_v38 }
 0x12f   : > { %546 = vrot.lane.b32.xlu1 %v1677_v23, %s1441_s29 }
 0x133   : > { %595 = vrot.lane.b32.xlu1 %v1673_v21, %s1440_s22 }
 0x137   : > { %597 = vrot.lane.b32.xlu1 %v1675_v22, %s1440_s22 }
 0x14f   : > { %v791_v39 = vpop.permute.xlu1 %790 }
 0x150   : > { %v793_v40 = vpop.permute.xlu0 %792 }
 0x151   : > { %v795_v41 = vsel %vm781_vm0, %v791_v39, %v793_v40 }
 0x152   : > { %1210 = vmatprep.subr.msk.mxu1 %vm1665_vm1, %v795_v41 }
 0x153   : > { %v789_v42 = vpop.permute.xlu1 %788 }
 0x154   : > { %v883_v43 = vpop.permute.xlu0 %882  ;;  %v794_v44 = vsel %vm781_vm0, %v789_v42, %v791_v39 }
 0x155   : > { %1211 = vmatpush1.msk.msra.mxu1 %vm1682_vm2, %v794_v44 }
 0x157   : > { %v881_v46 = vpop.permute.xlu1 %880 }
 0x158   : > { %v717_v47 = vpop.permute.xlu0 %716  ;;  %v885_v48 = vsel %vm768_vm3, %v881_v46, %v883_v43 }
 0x159   : > { %1012 = vmatprep.subr.mxu1 %v885_v48 }
 0x15b   : > { %v879_v49 = vpop.permute.xlu1 %878 }
 0x15c   : > { %v884_v51 = vsel %vm768_vm3, %v879_v49, %v881_v46  ;;  %v664_v52 = vpop.permute.xlu0 %663 }
 0x15d   : > { %1013 = vmatpush1.msra.mxu1 %v884_v51 }
 0x15f   : > { %v715_v53 = vpop.permute.xlu1 %714 }
 0x160   : > { %v719_v54 = vsel %vm705_vm4, %v715_v53, %v717_v47  ;;  %v873_v55 = vpop.permute.xlu0 %872 }
 0x161   : > { %1212 = vmatprep.subr.msk.mxu1 %vm1691_vm5, %v719_v54 }
 0x163   : > { %v713_v56 = vpop.permute.xlu1 %712 }
 0x164   : > { %v718_v57 = vsel %vm705_vm4, %v713_v56, %v715_v53  ;;  %v588_v60 = vpop.permute.xlu0 %587 }
 0x165   : > { %1213 = vmatpush1.msk.msra.mxu1 %vm1698_vm6, %v718_v57 }
 0x167   : > { %v662_v58 = vpop.permute.xlu1 %661 }
 0x168   : > { %v666_v59 = vsel %vm652_vm7, %v662_v58, %v664_v52  ;;  %v535_v63 = vpop.permute.xlu0 %534 }
 0x169   : > { %1214 = vmatprep.subr.msk.mxu1 %vm1665_vm1, %v666_v59 }
 0x16b   : > { %v660_v61 = vpop.permute.xlu1 %659 }
 0x16c   : > { %v665_v62 = vsel %vm652_vm7, %v660_v61, %v662_v58  ;;  %v863_v9 = vpop.permute.xlu0 %862 }
 0x16d   : > { %1215 = vmatpush1.msk.msra.mxu1 %vm1682_vm2, %v665_v62  ;;  %v466_v62 = vsel %vm1691_vm5, %v1675_v22, 0.0 }
 0x16f   : > { %v871_v1 = vpop.permute.xlu1 %870 }
 0x170   : > { %v875_v3 = vsel %vm639_vm8, %v871_v1, %v873_v55 }
 0x171   : > { %1018 = vmatprep.subr.mxu1 %v875_v3 }
 0x173   : > { %v869_v6 = vpop.permute.xlu1 %868 }
 0x174   : > { %v874_v8 = vsel %vm639_vm8, %v869_v6, %v871_v1  ;;  %v479_v6 = vrot.slane %v466_v62, %v1663_v14 }
 0x175   : > { %1019 = vmatpush1.msra.mxu1 %v874_v8 }
 0x177   : > { %v586_v10 = vpop.permute.xlu1 %585 }
 0x178   : > { %v590_v11 = vsel %vm576_vm9, %v586_v10, %v588_v60  ;;  %v465_v60 = vsel %vm1698_vm6, %v1673_v21, 0.0 }
 0x179   : > { %v486_v12 = vpop.permute.xlu0 %485  ;;  %1216 = vmatprep.subr.msk.mxu1 %vm1691_vm5, %v590_v11 }
 0x17a   : > { %v488_v15 = vmul.f32 %v486_v12, %v1673_v21  ;;  %v489_v16 = vmul.f32 %v486_v12, %v1675_v22  ;;  %v490_v18 = vmul.f32 %v486_v12, %v1677_v23 }
 0x17b   : > { %v584_v4 = vpop.permute.xlu1 %583 }
 0x17c   : > { %494 = vrot.lane.b32.xlu1 %v488_v15, %s1442_s15  ;;  %v589_v19 = vsel %vm576_vm9, %v584_v4, %v586_v10  ;;  %496 = vrot.lane.b32.xlu0 %v489_v16, %s1442_s15 }
 0x17d   : > { %1217 = vmatpush1.msk.msra.mxu1 %vm1698_vm6, %v589_v19 }
 0x17e   : > { %v470_v43 = vpop.permute.xlu0 %469 }
 0x17f   : > { %v533_v20 = vpop.permute.xlu1 %532  ;;  %v481_v4 = vmul.f32 %v479_v6, %v470_v43 }
 0x180   : > { %498 = vrot.lane.b32.xlu1 %v490_v18, %s1442_s15  ;;  %v537_v24 = vsel %vm520_vm10, %v533_v20, %v535_v63  ;;  %684 = vperm.xlu0 %1306, %v1771_v35   ;;  %v475_v63 = vrot.slane %v465_v60, %v1663_v14 }
 0x181   : > { %1218 = vmatprep.subr.msk.mxu1 %vm1665_vm1, %v537_v24 }
 0x182   : > { %v545_v46 = vpop.permute.xlu0 %544  ;;  %v480_v11 = vmul.f32 %v475_v63, %v470_v43 }
 0x183   : > { %v531_v25 = vpop.permute.xlu1 %530 }
 0x184   : > { %671 = vrot.lane.b32.xlu1 %v1673_v21, %s1438_s26  ;;  %v536_v26 = vsel %vm520_vm10, %v531_v25, %v533_v20  ;;  %675 = vrot.lane.b32.xlu0 %v1677_v23, %s1438_s26 }
 0x185   : > { %1219 = vmatpush1.msk.msra.mxu1 %vm1682_vm2, %v536_v26  ;;  %1308 = vset.pattern.permute.xlu0 %v1451_v27 }
 0x186   : > { %v609_v48 = vpop.permute.xlu0 %608 }
 0x187   : > { %v861_v28 = vpop.permute.xlu1 %860 }
 0x188   : > { %673 = vrot.lane.b32.xlu1 %v1675_v22, %s1438_s26  ;;  %v865_v29 = vsel %vm500_vm11, %v861_v28, %v863_v9  ;;  %724 = vrot.lane.b32.xlu0 %v1673_v21, %s1437_s25 }
 0x189   : > { %1024 = vmatprep.subr.mxu1 %v865_v29 }
 0x18a   : > { %v600_v49 = vpop.permute.xlu0 %599 }
 0x18b   : > { %v859_v30 = vpop.permute.xlu1 %858 }
 0x18c   : > { %737 = vperm.xlu1 %1307, %v1771_v35   ;;  %v864_v31 = vsel %vm500_vm11, %v859_v30, %v861_v28  ;;  %728 = vrot.lane.b32.xlu0 %v1677_v23, %s1437_s25 }
 0x18d   : > { %1025 = vmatpush1.msra.mxu1 %v864_v31 }
 0x18e   : > { %1220 = vmatprep.subr.msk.mxu1 %vm1691_vm5, %v1713_v7 }
 0x18f   : > { %1221 = vmatpush1.msk.msra.mxu1 %vm1698_vm6, %v1721_v13 }
 0x190   : > { %1222 = vmatmul.mubr.msk.f32.vlgmr.msra.gmra.mxu1 %vm889_vm12, %v986_v32  ;;  %726 = vrot.lane.b32.xlu1 %v1675_v22, %s1437_s25 }
 0x191   : > { %1310 = vset.pattern.permute.xlu1 %v1434_v0 }
 0x198   : > { %v625_v34 = vpop.permute.xlu1 %624 }
 0x199   : > { %v627_v2 = vmul.f32 %v625_v34, %v1673_v21  ;;  %v628_v5 = vmul.f32 %v625_v34, %v1675_v22  ;;  %v629_v36 = vmul.f32 %v625_v34, %v1677_v23 }
 0x19b   : > { %635 = vrot.lane.b32.xlu0 %v628_v5, %s1439_s24  ;;  %633 = vrot.lane.b32.xlu1 %v627_v2, %s1439_s24 }
 0x19d   : > { %v754_v7 = vpop.permute.xlu1 %753 }
 0x19e   : > { %v757_v13 = vmul.f32 %v754_v7, %v1675_v22  ;;  %v756_v37 = vmul.f32 %v754_v7, %v1673_v21  ;;  %v758_v38 = vmul.f32 %v754_v7, %v1677_v23 }
 0x19f   : > { %813 = vperm.xlu0 %1308, %v1771_v35   ;;  %637 = vrot.lane.b32.xlu1 %v629_v36, %s1439_s24  ;;  %v987_v35 = vld [vmem:[%s2003_s8] sm:$0xff] }
 0x1a2   : > { %v556_v39 = vpop.permute.xlu1 %555 }
 0x1a3   : > { %800 = vrot.lane.b32.xlu1 %v1673_v21, %s1435_s23  ;;  %804 = vrot.lane.b32.xlu0 %v1677_v23, %s1435_s23 }
 0x1a4   : > { %1309 = vset.pattern.permute.xlu0 %v1434_v0  ;;  %v966_v0 = vld [vmem:[%s1999_s4] sm:$0xff] }
 0x1a6   : > { %v543_v40 = vpop.permute.xlu1 %542 }
 0x1a7   : > { %802 = vrot.lane.b32.xlu1 %v1675_v22, %s1435_s23  ;;  %764 = vrot.lane.b32.xlu0 %v757_v13, %s1436_s19  ;;  %v548_v61 = vsel %vm520_vm10, %v543_v40, %v545_v46  ;;  %s1191_s23 = sshll.u32 %s1589_s11, 4 }
 0x1a8   : > { %v552_v3 = vsel %vm1682_vm2, %v548_v61, 0.0  ;;  %s361_s28 = scalar_lea.vmem [#allocation5], %s1191_s23 }
 0x1a9   : > { %v561_v12 = vrot.slane %v552_v3, %v1663_v14  ;;  %s1104_s14 = sshll.u32 %s361_s28, 4  ;;  %s1105_s14 = int_to_ptr.vmem [resolvable:$true] %s1104_s14 }
 0x1aa   : > { %v547_v41 = vpop.permute.xlu1 %546  ;;  %s1367_s22 = scalar_lea.vmem %s1105_s14, 256 }
 0x1ab   : > { %762 = vrot.lane.b32.xlu1 %v756_v37, %s1436_s19  ;;  %990 = vperm.xlu0 %1309, %v987_v35   ;;  %v549_v1 = vsel %vm520_vm10, %v545_v46, %v547_v41  ;;  %v566_v24 = vmul.f32 %v561_v12, %v556_v39  ;;  %p1368_p12 = scmp.ne.s32.totalorder %s1105_s14, %s1367_s22 }
 0x1ac   : > { %v553_v21 = vsel %vm1665_vm1, %v549_v1, 0.0 }
 0x1ad   : > { %v565_v18 = vrot.slane %v553_v21, %v1663_v14  ;;  %p1369_p0 = pnand %p1368_p12, %p2028_p13 }
 0x1ae   : > { %v596_v42 = vpop.permute.xlu1 %595 }
 0x1af   : > { %766 = vrot.lane.b32.xlu1 %v758_v38, %s1436_s19  ;;  %v567_v29 = vmul.f32 %v565_v18, %v556_v39  ;;  %s1230_s19 = sshll.u32 %s1524_s13, 8  ;;  %p1370_p1 = pneg %p1369_p0 }
 0x1b0   : > { %s1102_s17 = scalar_lea.hbm %s2004_s9, %s1230_s19  ;;  %s1452_s13 = smov [#allocation5]  }
 0x1b1   : > { %s1371_s29 = sshll.u32 %s1452_s13, 4  ;;  %s1372_s29 = int_to_ptr.vmem [resolvable:$false] %s1371_s29 }
 0x1b2   : > { %v598_v44 = vpop.permute.xlu1 %597  ;;  %s1373_s25 = scalar_lea.vmem %s1372_s29, 512  ;;  %p1374_p3 = scmp.lt.s32.totalorder %s1105_s14, %s1372_s29 }
 0x1b3   : > { %969 = vperm.xlu1 %1310, %v966_v0   ;;  %v601_v8 = vsel %vm576_vm9, %v596_v42, %v598_v44  ;;  %v602_v22 = vsel %vm576_vm9, %v598_v44, %v600_v49  ;;  %p1375_p8 = scmp.lt.s32.totalorder %s1373_s25, %s1367_s22 }
 0x1b4   : > { %v605_v15 = vsel %vm1698_vm6, %v601_v8, 0.0  ;;  %v606_v19 = vsel %vm1691_vm5, %v602_v22, 0.0 }
 0x1b5   : > { %v614_v25 = vrot.slane %v605_v15, %v1663_v14  ;;  %v618_v30 = vrot.slane %v606_v19, %v1663_v14  ;;  %p1376_p10 = por %p1375_p8, %p1374_p3 }
 0x1b7   : > { %v619_v34 = vmul.f32 %v614_v25, %v609_v48  ;;  %v620_v13 = vmul.f32 %v618_v30, %v609_v48  ;;  %p1377_p2 = pnand %p1376_p10, %p1370_p1 }
 0x1b8   : > { %v959_v17 = vpop.f32.mrf.mxu0 }
 0x1ee   : > { %v495_v47 = vpop.permute.xlu1 %494  ;;  %v497_v52 = vpop.permute.xlu0 %496 }
 0x1ef   : > { %v501_v16 = vsel %vm500_vm11, %v495_v47, %v497_v52 }
 0x1f0   : > { %v505_v26 = vadd.f32 %v501_v16, %v480_v11 }
 0x1f2   : > { %v499_v23 = vpop.permute.xlu1 %498  ;;  %v568_v2 = vadd.f32 %v566_v24, %v505_v26 }
 0x1f3   : > { %v502_v20 = vsel %vm500_vm11, %v497_v52, %v499_v23 }
 0x1f4   : > { %v506_v31 = vadd.f32 %v502_v20, %v481_v4  ;;  %v621_v41 = vadd.f32 %v619_v34, %v568_v2 }
 0x1f6   : > { %v672_v51 = vpop.permute.xlu1 %671  ;;  %v569_v37 = vadd.f32 %v567_v29, %v506_v31 }
 0x1f8   : > { %v622_v46 = vadd.f32 %v620_v13, %v569_v37 }
 0x1fa   : > { %v674_v53 = vpop.permute.xlu1 %673 }
 0x1fb   : > { %v685_v54 = vpop.permute.xlu0 %684  ;;  %v677_v32 = vsel %vm652_vm7, %v672_v51, %v674_v53 }
 0x1fc   : > { %v681_v7 = vsel %vm1682_vm2, %v677_v32, 0.0 }
 0x1fd   : > { %v690_v39 = vrot.slane %v681_v7, %v1663_v14 }
 0x1ff   : > { %v676_v56 = vpop.permute.xlu0 %675  ;;  %v695_v49 = vmul.f32 %v690_v39, %v685_v54 }
 0x200   : > { %v678_v5 = vsel %vm652_vm7, %v674_v53, %v676_v56 }
 0x201   : > { %v682_v0 = vsel %vm1665_vm1, %v678_v5, 0.0 }
 0x202   : > { %v694_v44 = vrot.slane %v682_v0, %v1663_v14 }
 0x203   : > { %v725_v58 = vpop.permute.xlu0 %724 }
 0x204   : > { %v696_v50 = vmul.f32 %v694_v44, %v685_v54 }
 0x207   : > { %v1901_v55 = vpop.permute.xlu1 %737  ;;  %v729_v9 = vpop.permute.xlu0 %728 }
 0x20b   : > { %v727_v57 = vpop.permute.xlu1 %726 }
 0x20c   : > { %v730_v35 = vsel %vm705_vm4, %v725_v58, %v727_v57  ;;  %v731_v40 = vsel %vm705_vm4, %v727_v57, %v729_v9 }
 0x20d   : > { %v636_v27 = vpop.permute.xlu0 %635  ;;  %v734_v42 = vsel %vm1698_vm6, %v730_v35, 0.0  ;;  %v735_v48 = vsel %vm1691_vm5, %v731_v40, 0.0 }
 0x20e   : > { %v743_v51 = vrot.slane %v734_v42, %v1663_v14  ;;  %v747_v57 = vrot.slane %v735_v48, %v1663_v14 }
 0x20f   : > { %v634_v59 = vpop.permute.xlu1 %633 }
 0x210   : > { %v640_v43 = vsel %vm639_vm8, %v634_v59, %v636_v27  ;;  %v748_v45 = vmul.f32 %v743_v51, %v1901_v55  ;;  %v749_v1 = vmul.f32 %v747_v57, %v1901_v55  ;;  %v961_v55 = vpop.f32.mrf.mxu0 }
 0x211   : > { %v644_v52 = vadd.f32 %v640_v43, %v621_v41 }
 0x213   : > { %v638_v10 = vpop.permute.xlu1 %637  ;;  %v697_v61 = vadd.f32 %v695_v49, %v644_v52 }
 0x214   : > { %v641_v23 = vsel %vm639_vm8, %v636_v27, %v638_v10 }
 0x215   : > { %v645_v58 = vadd.f32 %v641_v23, %v622_v46  ;;  %v750_v10 = vadd.f32 %v748_v45, %v697_v61 }
 0x217   : > { %v801_v28 = vpop.permute.xlu1 %800  ;;  %v698_v3 = vadd.f32 %v696_v50, %v645_v58 }
 0x219   : > { %v751_v11 = vadd.f32 %v749_v1, %v698_v3 }
 0x21a   : > { %v814_v36 = vpop.permute.xlu0 %813 }
 0x21b   : > { %v803_v38 = vpop.permute.xlu1 %802 }
 0x21c   : > { %v806_v53 = vsel %vm781_vm0, %v801_v28, %v803_v38 }
 0x21d   : > { %v810_v60 = vsel %vm1682_vm2, %v806_v53, 0.0 }
 0x21e   : > { %v805_v47 = vpop.permute.xlu0 %804  ;;  %v819_v54 = vrot.slane %v810_v60, %v1663_v14 }
 0x21f   : > { %v763_v56 = vpop.permute.xlu1 %762  ;;  %v807_v59 = vsel %vm781_vm0, %v803_v38, %v805_v47 }
 0x220   : > { %v811_v63 = vsel %vm1665_vm1, %v807_v59, 0.0  ;;  %v824_v12 = vmul.f32 %v819_v54, %v814_v36 }
 0x221   : > { %v823_v9 = vrot.slane %v811_v63, %v1663_v14 }
 0x222   : > { %v765_v62 = vpop.permute.xlu0 %764 }
 0x223   : > { %v767_v6 = vpop.permute.xlu1 %766  ;;  %v769_v8 = vsel %vm768_vm3, %v763_v56, %v765_v62  ;;  %v825_v15 = vmul.f32 %v823_v9, %v814_v36 }
 0x224   : > { %v770_v33 = vsel %vm768_vm3, %v765_v62, %v767_v6  ;;  %v773_v21 = vadd.f32 %v769_v8, %v750_v10 }
 0x225   : > { %v774_v22 = vadd.f32 %v770_v33, %v751_v11 }
 0x226   : > { %v826_v16 = vadd.f32 %v824_v12, %v773_v21  ;;  %v991_v27 = vpop.permute.xlu0 %990 }
 0x227   : > { %v827_v4 = vadd.f32 %v825_v15, %v774_v22 }
 0x228   : > { %v964_v19 = vadd.f32 %v959_v17, %v826_v16 }
 0x229   : > { %v965_v20 = vadd.f32 %v961_v55, %v827_v4 }
 0x22e   : > { %v970_v18 = vpop.permute.xlu1 %969 }
 0x22f   : > { %v972_v24 = vadd.f32 %v970_v18, %v964_v19  ;;  %v973_v25 = vadd.f32 %v970_v18, %v965_v20 }
 0x231   : > { %v1208_v26 = vmul.f32 -1.442695, %v972_v24  ;;  %v1209_v14 = vmul.f32 -1.442695, %v973_v25 }
 0x233   : > { %1323 = vpow2.f32 %v1208_v26 }
 0x234   : > { %1325 = vpow2.f32 %v1209_v14 }
 0x240   : > { %v1324_v2 = vpop.eup %1323 }
 0x241   : > { %v1326_v5 = vpop.eup %1325  ;;  %v980_v7 = vadd.f32 1.0, %v1324_v2 }
 0x242   : > { %v981_v35 = vadd.f32 1.0, %v1326_v5 }
 0x250   : > { %v1062_v28 = vpop.f32.mrf.mxu1 }
 0x251   : > { %v1063_v29 = vadd.f32 %v1062_v28, %v991_v27 }
 0x252   : > { %v1064_v30 = vpop.f32.mrf.mxu1 }
 0x253   : > { %v1223_v31 = vmul.f32 -1.442695, %v1063_v29  ;;  %v1065_v32 = vadd.f32 %v1064_v30, %v991_v27  ;;  %v1069_v0 = vadd.f32 0.5, %v1063_v29  ;;  %vm1067_vm13 = vcmp.ge.f32.partialorder %v1063_v29, 0.0 }
 0x255   : > { %1327 = vpow2.f32 %v1223_v31  ;;  %v1224_v34 = vmul.f32 -1.442695, %v1065_v32  ;;  %v1070_v42 = vadd.f32 0.5, %v1065_v32  ;;  %vm1068_vm14 = vcmp.ge.f32.partialorder %v1065_v32, 0.0 }
 0x257   : > { %1329 = vpow2.f32 %v1224_v34 }
 0x262   : > { %v1328_v36 = vpop.eup %1327 }
 0x263   : > { %v1077_v13 = vadd.f32 1.0, %v1328_v36 }
 0x264   : > { %v1330_v37 = vpop.eup %1329 }
 0x265   : > { %1331 = vrcp.f32 %v1077_v13  ;;  %v1078_v38 = vadd.f32 1.0, %v1330_v37 }
 0x266   : > { %1333 = vrcp.f32 %v980_v7 }
 0x267   : > { %1335 = vrcp.f32 %v1078_v38 }
 0x268   : > { %1337 = vrcp.f32 %v981_v35 }
 0x272   : > { %v1332_v39 = vpop.eup %1331 }
 0x273   : > { %v1334_v40 = vpop.eup %1333  ;;  %v1083_v41 = vsel %vm1067_vm13, %v1069_v0, %v1332_v39 }
 0x274   : > { %v1336_v43 = vpop.eup %1335  ;;  %v1085_v44 = vmul.f32 %v1334_v40, %v1083_v41 }
 0x275   : > { %v1338_v46 = vpop.eup %1337  ;;  %v1084_v47 = vsel %vm1068_vm14, %v1070_v42, %v1336_v43 }
 0x276   : > { %v1086_v48 = vmul.f32 %v1338_v46, %v1084_v47  ;;  %1087 = vst [vmem:[%s361_s28] sm:$0xff] %v1085_v44 }
 0x278   : > { %1088 = vst [vmem:[%s361_s28 + $0x8] sm:$0xff] %v1086_v48 }
 0x279   : > { %1380 = shalt.err (!%p1377_p2)
}
 0x27a   : > { %s1381_s26 = scalar_lea.hbm %s1102_s17, 256  ;;  %s1385_s15 = scalar_lea.hbm %s2004_s9, 512 }
 0x27b   : > { %p1382_p4 = scmp.ne.s32.totalorder %s1102_s17, %s1381_s26  ;;  %p1386_p5 = scmp.lt.s32.totalorder %s1102_s17, %s2004_s9 }
 0x27c   : > { %p1387_p6 = scmp.lt.s32.totalorder %s1385_s15, %s1381_s26 }
 0x27d   : > { %p1383_p9 = pnand %p1382_p4, %p2028_p13 }
 0x27e   : > { %p1388_p11 = por %p1387_p6, %p1386_p5 }
 0x27f   : > { %p1384_p7 = pneg %p1383_p9 }
 0x281   : > { %p1389_p12 = pnand %p1388_p11, %p1384_p7 }
 0x283   : > { %1392 = shalt.err (!%p1389_p12)
}
 0x284   : > { %1237 = dma.vmem_to_hbm [thread:$0]  (%p2028_p13), %s1105_s14, 256, %s1102_s17, %s1090_s27  }
 0x285 PF: > { %s1116_s28 = sand.u32 1, %s1419_s30   ;;  %p2029_p0 = scmp.ne.s32.totalorder %s2015_s21, 0 }
 0x286   : > { %p2030_p1 = scmp.ge.s32.totalorder %s1431_s12, 2  ;;  %s1117_s16 = scalar_lea.sflag [#allocation4], %s1116_s28 }
 0x288   : > { %p1244_p3 = pnand %p2030_p1, %p2029_p0 }
 0x28a   : > { %p1245_p8 = pneg %p1244_p3 }
 0x28c   : > { %1414 = dma.done.wait (%p1245_p8), %s1117_s16, 256  }
 0x28d   : > { %1416 = vsyncadd (%p1245_p8), %s1117_s16, 4294967040  ;;  %s2031_s12 = sld [smem:[#allocation9_spill]]  ;;  %s2034_s30 = smov %s1423_s10 }
 0x28e   : > { %s2032_s18 = sld [smem:[#allocation8_spill]] }
 0x28f   : > { %s2033_s11 = sld [smem:[#allocation10_spill]] }
 0x293   : > { %p22_p10 = scmp.ge.s32.totalorder %s2031_s12, 4  }
 0x294   : > { %s2035_s10 = smov %s2032_s18 }
 0x295   :  { %24 = sbr.rel (!%p22_p10) target bundleno = 5 (0x5), region = 104 }
 0x29a   :  { %1122 = vsyncpa [#allocation3], 1 }
 0x29b   :  { %1124 = vsyncpa [#allocation3 + $0x1], 1 }
 0x29c   :  { %1125 = vsyncpa [#allocation4], 1 }
 0x29d   :  { %1127 = vsyncpa [#allocation4 + $0x1], 1 }

</bundles_post_ra>
